<compile_context>
chip_gen: v6e
topology: v6e:2x2x1
jax: 0.10.0
libtpu: 0.0.40
codegen_flags: <defaults>
</compile_context>

<pallas_src>
import jax
import jax.numpy as jnp
from jax.experimental import pallas as pl
from jax.experimental.pallas import tpu as pltpu


def _dor_mlp_kernel(x_ref, wwt_ref, wh_ref, bias_ref, o_ref):
    bt, h, w = x_ref.shape
    x = x_ref[...]                                            # (Bt, H, W)

    # Width branch: one row-dense matmul over all Bt planes.
    # (Bt, H, W) -> (Bt*H, W); layout-free when H % 8 == 0.
    out_w = jnp.dot(x.reshape(bt * h, w), wwt_ref[...],
                    preferred_element_type=jnp.float32).reshape(bt, h, w)

    # Height branch: Wh @ x[b] for every plane in the block as one batched
    # matmul (same pattern as flash-attention's batched einsum).
    wh_b = jnp.broadcast_to(wh_ref[...][None, :, :], (bt, h, h))
    out_h = jax.lax.dot_general(
        wh_b, x,
        dimension_numbers=(((2,), (1,)), ((0,), (0,))),
        preferred_element_type=jnp.float32)                   # (Bt, H, W)

    out = out_w + out_h + bias_ref[...][None, :, :]
    o_ref[...] = out.astype(o_ref.dtype)


def dor_mlp_pallas(x, params, *, block_planes=None):
    """x: (N, C, H, W) float32 with H == W == img_size."""
    N, C, H, W = x.shape
    assert H == W, "img_size must equal both spatial dims"
    ww1, bw1, wh1, bh1, ww2, bw2, wh2, bh2 = params

    # --- exact algebraic fold of the two linear OR_MLP branches (host side) ---
    wwt = jnp.transpose(ww1 + ww2)                            # (W, W), pre-transposed
    wh = wh1 + wh2                                            # (H, H)
    bias = (bw1 + bw2).reshape(1, W) + (bh1 + bh2).reshape(H, 1)   # (H, W)

    nc = N * C
    x3 = x.reshape(nc, H, W)

    if block_planes is None:
        # Target >= 512 MXU rows per step, but keep the f32 in+out activation
        # blocks (double-buffered) under ~12 MiB so the default scoped VMEM
        # limit is comfortable on every TPU generation (incl. v7x's 64 MiB).
        vmem_budget = 12 * 1024 * 1024
        bt_vmem = max(1, vmem_budget // (4 * 4 * H * W))
        bt_rows = max(1, pl.cdiv(512, H))
        block_planes = int(min(nc, bt_rows, bt_vmem, 64))
    bt = max(1, int(block_planes))

    # Pad the plane count up to a multiple of Bt (padding planes are computed
    # independently and sliced off, so they never affect real outputs).
    nc_pad = pl.cdiv(nc, bt) * bt
    if nc_pad != nc:
        x3 = jnp.pad(x3, ((0, nc_pad - nc), (0, 0), (0, 0)))

    grid = (nc_pad // bt,)
    flops = 2 * nc_pad * H * W * (H + W)
    bytes_accessed = (2 * nc_pad * H * W + 2 * W * W + H * W) * 4

    plane_spec = pl.BlockSpec((bt, H, W), lambda i: (i, 0, 0))

    out3 = pl.pallas_call(
        _dor_mlp_kernel,
        out_shape=jax.ShapeDtypeStruct((nc_pad, H, W), x.dtype),
        grid_spec=pltpu.PrefetchScalarGridSpec(
            num_scalar_prefetch=0,
            grid=grid,
            in_specs=[
                plane_spec,
                pl.BlockSpec((W, W), lambda i: (0, 0)),   # folded, pre-transposed width weight
                pl.BlockSpec((H, H), lambda i: (0, 0)),   # folded height weight
                pl.BlockSpec((H, W), lambda i: (0, 0)),   # combined bias plane
            ],
            out_specs=plane_spec,
        ),
        compiler_params=pltpu.CompilerParams(
            dimension_semantics=("parallel",)),
        cost_estimate=pl.CostEstimate(
            flops=flops, transcendentals=0, bytes_accessed=bytes_accessed),
    )(x3, wwt, wh, bias)

    return out3[:nc].reshape(N, C, H, W)


def init_params(key, img_size):
    """Deterministic nn.Linear-style init: U(-1/sqrt(fan_in), 1/sqrt(fan_in))."""
    bound = 1.0 / jnp.sqrt(jnp.float32(img_size))
    keys = jax.random.split(key, 8)

    def u(k, shape):
        return jax.random.uniform(k, shape, jnp.float32, -bound, bound)

    ww1 = u(keys[0], (img_size, img_size))
    bw1 = u(keys[1], (1, img_size))           # width bias (row vector)
    wh1 = u(keys[2], (img_size, img_size))
    bh1 = u(keys[3], (img_size, 1))           # height bias (column vector)
    ww2 = u(keys[4], (img_size, img_size))
    bw2 = u(keys[5], (1, img_size))
    wh2 = u(keys[6], (img_size, img_size))
    bh2 = u(keys[7], (img_size, 1))
    return (ww1, bw1, wh1, bh1, ww2, bw2, wh2, bh2)


def dor_mlp_reference(x, params):
    """Pure-JAX reference matching the PyTorch forward semantics (un-folded)."""
    ww1, bw1, wh1, bh1, ww2, bw2, wh2, bh2 = params

    def r_mlp_width(x, w, b):      # nn.Linear on last dim (W)
        return jnp.einsum('nchw,vw->nchv', x, w) + b.reshape(-1)

    def r_mlp_height(x, w, b):     # permute(0,1,3,2) -> Linear -> permute back
        return jnp.einsum('vh,nchw->ncvw', w, x) + b.reshape(-1, 1)

    out1 = r_mlp_width(x, ww1, bw1) + r_mlp_height(x, wh1, bh1)
    out2 = r_mlp_width(x, ww2, bw2) + r_mlp_height(x, wh2, bh2)
    return out1 + out2


if __name__ == "__main__":
    N, C, IMG = 2, 4, 16
    key = jax.random.PRNGKey(0)
    kx, kp = jax.random.split(key)

    x = jax.random.normal(kx, (N, C, IMG, IMG), jnp.float32)
    params = init_params(kp, IMG)

    out = dor_mlp_pallas(x, params)
    out = jax.block_until_ready(out)

    ref = dor_mlp_reference(x, params)
    assert out.shape == (N, C, IMG, IMG)
    assert jnp.allclose(out, ref, atol=1e-4, rtol=1e-4)

    print("KERNEL_OK")
</pallas_src>

<mosaic_0001>
module attributes {stable_mosaic.version = 11 : i64} {
  func.func @_dor_mlp_kernel(%arg0: i32, %arg1: memref<8x16x16xf32, #tpu.memory_space<vmem>>, %arg2: memref<16x16xf32, #tpu.memory_space<vmem>>, %arg3: memref<16x16xf32, #tpu.memory_space<vmem>>, %arg4: memref<16x16xf32, #tpu.memory_space<vmem>>, %arg5: memref<8x16x16xf32, #tpu.memory_space<vmem>>) attributes {dimension_semantics = [#tpu.dimension_semantics<parallel>], iteration_bounds = array<i64: 1>, scalar_prefetch = 0 : i64, scratch_operands = 0 : i64, tpu.core_type = #tpu.core_type<tc>, window_params = [{transform_indices = @transform_0, window_bounds = array<i64: 8, 16, 16>}, {pipeline_mode = #tpu.pipeline_mode<synchronous>, transform_indices = @transform_1, window_bounds = array<i64: 16, 16>}, {pipeline_mode = #tpu.pipeline_mode<synchronous>, transform_indices = @transform_2, window_bounds = array<i64: 16, 16>}, {pipeline_mode = #tpu.pipeline_mode<synchronous>, transform_indices = @transform_3, window_bounds = array<i64: 16, 16>}, {transform_indices = @transform_4, window_bounds = array<i64: 8, 16, 16>}]} {
    %c0 = arith.constant 0 : index
    %c0_0 = arith.constant 0 : index
    %c0_1 = arith.constant 0 : index
    %0 = vector.load %arg1[%c0, %c0_0, %c0_1] : memref<8x16x16xf32, #tpu.memory_space<vmem>>, vector<8x16x16xf32>
    %1 = vector.shape_cast %0 : vector<8x16x16xf32> to vector<128x16xf32>
    %c0_2 = arith.constant 0 : index
    %c0_3 = arith.constant 0 : index
    %2 = vector.load %arg2[%c0_2, %c0_3] : memref<16x16xf32, #tpu.memory_space<vmem>>, vector<16x16xf32>
    %cst = arith.constant dense<0.000000e+00> : vector<128x16xf32>
    %3 = tpu.matmul %1, %2, %cst {dimension_numbers = #tpu.dot_dimension_numbers<[1], [0], [0], [1], [0, 0, 1, 1], [], []>} : vector<128x16xf32>, vector<16x16xf32>, vector<128x16xf32> -> vector<128x16xf32>
    %4 = vector.shape_cast %3 : vector<128x16xf32> to vector<8x16x16xf32>
    %c0_4 = arith.constant 0 : index
    %c0_5 = arith.constant 0 : index
    %5 = vector.load %arg3[%c0_4, %c0_5] : memref<16x16xf32, #tpu.memory_space<vmem>>, vector<16x16xf32>
    %6 = vector.shape_cast %5 : vector<16x16xf32> to vector<1x16x16xf32>
    %7 = vector.shape_cast %6 : vector<1x16x16xf32> to vector<1x16x16xf32>
    %8 = vector.broadcast %7 : vector<1x16x16xf32> to vector<8x16x16xf32>
    %cst_6 = arith.constant dense<0.000000e+00> : vector<8x16x16xf32>
    %9 = tpu.matmul %8, %0, %cst_6 {dimension_numbers = #tpu.dot_dimension_numbers<[2], [1], [1], [2], [0, 0, 0, 1, 1, 2], [0], [0]>} : vector<8x16x16xf32>, vector<8x16x16xf32>, vector<8x16x16xf32> -> vector<8x16x16xf32>
    %10 = arith.addf %4, %9 : vector<8x16x16xf32>
    %c0_7 = arith.constant 0 : index
    %c0_8 = arith.constant 0 : index
    %11 = vector.load %arg4[%c0_7, %c0_8] : memref<16x16xf32, #tpu.memory_space<vmem>>, vector<16x16xf32>
    %12 = vector.shape_cast %11 : vector<16x16xf32> to vector<1x16x16xf32>
    %13 = vector.broadcast %12 : vector<1x16x16xf32> to vector<8x16x16xf32>
    %14 = arith.addf %10, %13 : vector<8x16x16xf32>
    %c0_9 = arith.constant 0 : index
    %c0_10 = arith.constant 0 : index
    %c0_11 = arith.constant 0 : index
    %15 = vector.load %arg5[%c0_9, %c0_10, %c0_11] : memref<8x16x16xf32, #tpu.memory_space<vmem>>, vector<8x16x16xf32>
    tpu.vector_store %arg5[%c0_9, %c0_10, %c0_11], %14 {strides = array<i32>} : memref<8x16x16xf32, #tpu.memory_space<vmem>>, vector<8x16x16xf32>,
    return
  }
  func.func @transform_0(%arg0: i32) -> (i32, i32, i32) {
    %c0_i32 = arith.constant 0 : i32
    %c0_i32_0 = arith.constant 0 : i32
    %c0_i32_1 = arith.constant 0 : i32
    return %arg0, %c0_i32, %c0_i32_0 : i32, i32, i32
  }
  func.func @transform_1(%arg0: i32) -> (i32, i32) {
    %c0_i32 = arith.constant 0 : i32
    %c0_i32_0 = arith.constant 0 : i32
    %c0_i32_1 = arith.constant 0 : i32
    return %c0_i32, %c0_i32_0 : i32, i32
  }
  func.func @transform_2(%arg0: i32) -> (i32, i32) {
    %c0_i32 = arith.constant 0 : i32
    %c0_i32_0 = arith.constant 0 : i32
    %c0_i32_1 = arith.constant 0 : i32
    return %c0_i32, %c0_i32_0 : i32, i32
  }
  func.func @transform_3(%arg0: i32) -> (i32, i32) {
    %c0_i32 = arith.constant 0 : i32
    %c0_i32_0 = arith.constant 0 : i32
    %c0_i32_1 = arith.constant 0 : i32
    return %c0_i32, %c0_i32_0 : i32, i32
  }
  func.func @transform_4(%arg0: i32) -> (i32, i32, i32) {
    %c0_i32 = arith.constant 0 : i32
    %c0_i32_0 = arith.constant 0 : i32
    %c0_i32_1 = arith.constant 0 : i32
    return %arg0, %c0_i32, %c0_i32_0 : i32, i32, i32
  }
}

</mosaic_0001>

<bundles_post_ra>
// kernel: tpu_custom_call.1
= control target key start
LH: loop header
LB: loop body
LE: loop exit
PB: predicated region body
PF: predicated region fallthrough
CT: control target
= control target key end

     0   :  { %9 = vsyncpa [#allocation3], 0  ;;  %s1393_s0 = inlined_call_operand.hbm [shape: f32[8,16,16], index: 0, kind: input, shape index: {}]   ;;  %s1394_s1 = inlined_call_operand.hbm [shape: f32[16,16], index: 1, kind: input, shape index: {}]   ;;  %s1395_s2 = inlined_call_operand.hbm [shape: f32[16,16], index: 2, kind: input, shape index: {}]   ;;  %s1396_s3 = inlined_call_operand.hbm [shape: f32[16,16], index: 3, kind: input, shape index: {}]   ;;  %s1397_s4 = inlined_call_operand.hbm [shape: f32[8,16,16], index: 4, kind: output, shape index: {}]  }
   0x1   :  { %10 = vsyncpa [#allocation6], 0 }
   0x2   :  { %11 = vsyncpa [#allocation9], 0 }
   0x3   :  { %12 = vsyncpa [#allocation4], 0  ;;  %s1243_s15 = smov [#allocation5]   ;;  %s1244_s17 = smov [#allocation2]  }
   0x4   :  { %s30_s16 = sshll.u32 %s1243_s15, 4  ;;  %s18_s18 = sshll.u32 %s1244_s17, 4  ;;  %s31_s16 = int_to_ptr.vmem [resolvable:$true] %s30_s16  ;;  %s19_s18 = int_to_ptr.vmem [resolvable:$true] %s18_s18 }
   0x5   :  { %s1143_s19 = scalar_lea.vmem %s31_s16, 256  ;;  %p1148_p1 = scmp.lt.s32.totalorder %s31_s16, %s31_s16 }
   0x6   :  { %p1144_p0 = scmp.ne.s32.totalorder %s31_s16, %s1143_s19  ;;  %p1149_p2 = scmp.lt.s32.totalorder %s1143_s19, %s1143_s19 }
   0x8   :  { %p1150_p3 = por %p1149_p2, %p1148_p1 }
   0xa   :  { %p1151_p4 = pnand %p1150_p3, %p1144_p0 }
   0xc   :  { %1154 = shalt.err (!%p1151_p4)
}
   0xd   :  { %s1245_s20 = smov 128   ;;  %s1246_s21 = smov 8  }
   0xe   :  { %36 = dma.hbm_to_vmem [thread:$0]  %s1394_s1, 256, %s31_s16, [#allocation6], %s1245_s20, %s1245_s20, %s1246_s21  }
   0xf   :  { %s1163_s24 = scalar_lea.vmem %s19_s18, 2048  ;;  %p1168_p6 = scmp.lt.s32.totalorder %s19_s18, %s19_s18 }
  0x10   :  { %p1164_p5 = scmp.ne.s32.totalorder %s19_s18, %s1163_s24  ;;  %p1169_p7 = scmp.lt.s32.totalorder %s1163_s24, %s1163_s24 }
  0x12   :  { %p1170_p8 = por %p1169_p7, %p1168_p6 }
  0x14   :  { %p1171_p9 = pnand %p1170_p8, %p1164_p5 }
  0x16   :  { %1174 = shalt.err (!%p1171_p9)
}
  0x17   :  { %24 = dma.hbm_to_vmem [thread:$0]  %s1393_s0, 2048, %s19_s18, [#allocation3], %s1245_s20, %s1245_s20, %s1246_s21  }
  0x18   :  { %s1247_s27 = smov [#allocation7]   ;;  %s1248_s29 = smov [#allocation8]  }
  0x19   :  { %s42_s28 = sshll.u32 %s1247_s27, 4  ;;  %s54_s30 = sshll.u32 %s1248_s29, 4  ;;  %s43_s28 = int_to_ptr.vmem [resolvable:$true] %s42_s28  ;;  %s55_s30 = int_to_ptr.vmem [resolvable:$true] %s54_s30 }
  0x1a   :  { %s1183_s1 = scalar_lea.vmem %s43_s28, 256  ;;  %p1188_p11 = scmp.lt.s32.totalorder %s43_s28, %s43_s28 }
  0x1b   :  { %p1184_p10 = scmp.ne.s32.totalorder %s43_s28, %s1183_s1  ;;  %p1189_p12 = scmp.lt.s32.totalorder %s1183_s1, %s1183_s1 }
  0x1d   :  { %p1190_p13 = por %p1189_p12, %p1188_p11 }
  0x1f   :  { %p1191_p0 = pnand %p1190_p13, %p1184_p10 }
  0x21   :  { %1194 = shalt.err (!%p1191_p0)
}
  0x22   :  { %48 = dma.hbm_to_vmem [thread:$0]  %s1395_s2, 256, %s43_s28, [#allocation6], %s1245_s20, %s1245_s20, %s1246_s21  }
  0x23   :  { %s1203_s0 = scalar_lea.vmem %s55_s30, 256  ;;  %p1208_p2 = scmp.lt.s32.totalorder %s55_s30, %s55_s30 }
  0x24   :  { %p1204_p1 = scmp.ne.s32.totalorder %s55_s30, %s1203_s0  ;;  %p1209_p3 = scmp.lt.s32.totalorder %s1203_s0, %s1203_s0 }
  0x26   :  { %p1210_p4 = por %p1209_p3, %p1208_p2 }
  0x28   :  { %p1211_p5 = pnand %p1210_p4, %p1204_p1 }
  0x2a   :  { %1214 = shalt.err (!%p1211_p5)
}
  0x2b   :  { %60 = dma.hbm_to_vmem [thread:$0]  %s1396_s3, 256, %s55_s30, [#allocation9], %s1245_s20, %s1245_s20, %s1246_s21  }
  0x2c   :  { %1235 = dma.done.wait [#allocation3], 2048  }
  0x2d   :  { %1236 = vsyncadd [#allocation3], 4294965248 }
  0x2e   :  { %1237 = dma.done.wait [#allocation6], 512  }
  0x2f   :  { %1238 = vsyncadd [#allocation6], 4294966784 }
  0x30   :  { %1239 = dma.done.wait [#allocation9], 256  }
  0x31   :  { %1240 = vsyncadd [#allocation9], 4294967040  ;;  %v90_v0 = vld [vmem:[#allocation5 + $0x8] sm:$0xff]  ;;  %v89_v2 = vld [vmem:[#allocation5] sm:$0xff]  ;;  %vm91_vm0 = vcmask 130048   ;;  %s1249_s2 = smov [#allocation10]  }
  0x32   :  { %v74_v1 = vld [vmem:[#allocation2 + $0x8] sm:$0xff]  ;;  %1044 = vmatprep.subr.mxu0 %v90_v0  ;;  %v73_v3 = vld [vmem:[#allocation2] sm:$0xff]  ;;  %v1299_v4 = vld [vmem:[#allocation7] sm:$0xff]  ;;  %s948_s3 = sshll.u32 %s1249_s2, 4  ;;  %s949_s3 = int_to_ptr.vmem [resolvable:$true] %s948_s3 }
  0x33   :  { %1072 = vmatprep.subr.mxu1 %v74_v1  ;;  %1045 = vmatpush3.msra.mxu0 %v90_v0  ;;  %v1301_v5 = vld [vmem:[#allocation7 + $0x8] sm:$0xff]  ;;  %v75_v7 = vld [vmem:[#allocation2 + $0x10] sm:$0xff]  ;;  %v78_v8 = vld [vmem:[#allocation2 + $0x28] sm:$0xff]  ;;  %s1215_s9 = scalar_lea.vmem %s949_s3, 2048  ;;  %p1220_p7 = scmp.lt.s32.totalorder %s949_s3, %s949_s3 }
  0x34   :  { %1073 = vmatpush3.msra.mxu1 %v74_v1  ;;  %1046 = vmatprep.subr.mxu0 %v89_v2  ;;  %v76_v6 = vld [vmem:[#allocation2 + $0x18] sm:$0xff]  ;;  %v77_v9 = vld [vmem:[#allocation2 + $0x20] sm:$0xff]  ;;  %v79_v11 = vld [vmem:[#allocation2 + $0x30] sm:$0xff]  ;;  %p1216_p6 = scmp.ne.s32.totalorder %s949_s3, %s1215_s9  ;;  %p1221_p8 = scmp.lt.s32.totalorder %s1215_s9, %s1215_s9 }
  0x35   :  { %1074 = vmatprep.subr.mxu1 %v73_v3  ;;  %1047 = vmatpush3.msra.mxu0 %v89_v2  ;;  %v80_v10 = vld [vmem:[#allocation2 + $0x38] sm:$0xff]  ;;  %v82_v12 = vld [vmem:[#allocation2 + $0x48] sm:$0xff]  ;;  %v81_v13 = vld [vmem:[#allocation2 + $0x40] sm:$0xff] }
  0x36   :  { %1048 = vmatprep.mubr.msk.f32.mxu0 %vm91_vm0, %v73_v3  ;;  %1075 = vmatpush3.msra.mxu1 %v73_v3  ;;  %v84_v14 = vld [vmem:[#allocation2 + $0x58] sm:$0xff]  ;;  %v83_v15 = vld [vmem:[#allocation2 + $0x50] sm:$0xff]  ;;  %v86_v16 = vld [vmem:[#allocation2 + $0x68] sm:$0xff]  ;;  %p1222_p9 = por %p1221_p8, %p1220_p7 }
  0x37   :  { %1076 = vmatprep.mubr.msk.f32.mxu1 %vm91_vm0, %v1299_v4  ;;  %1049 = vmatmul.mubr.msk.f32.vlgmr.msra.gmra.mxu0 %vm91_vm0, %v74_v1  ;;  %v85_v17 = vld [vmem:[#allocation2 + $0x60] sm:$0xff]  ;;  %v88_v18 = vld [vmem:[#allocation2 + $0x78] sm:$0xff]  ;;  %v87_v19 = vld [vmem:[#allocation2 + $0x70] sm:$0xff] }
  0x38   :  { %1077 = vmatmul.mubr.msk.f32.vlgmr.msra.gmra.mxu1 %vm91_vm0, %v1301_v5  ;;  %1079 = vmatprep.subr.mxu1 %v76_v6  ;;  %v1351_v22 = vld [vmem:[#allocation8 + $0x8] sm:$0xff]  ;;  %v1353_v26 = vld [vmem:[#allocation8] sm:$0xff]  ;;  %p1223_p10 = pnand %p1222_p9, %p1216_p6 }
  0x39   :  { %1051 = vmatprep.mubr.msk.f32.mxu0 %vm91_vm0, %v75_v7  ;;  %1080 = vmatpush3.msra.mxu1 %v76_v6 }
  0x3a   :  { %1083 = vmatprep.mubr.msk.f32.mxu1 %vm91_vm0, %v1299_v4  ;;  %1081 = vmatprep.subr.mxu1 %v75_v7 }
  0x3b   :  { %1082 = vmatpush3.msra.mxu1 %v75_v7  ;;  %1052 = vmatmul.mubr.msk.f32.gmra.mxu0 %vm91_vm0, %v76_v6 }
  0x3c   :  { %1084 = vmatmul.mubr.msk.f32.vlgmr.msra.gmra.mxu1 %vm91_vm0, %v1301_v5  ;;  %1086 = vmatprep.subr.mxu1 %v78_v8 }
  0x3d   :  { %1087 = vmatpush3.msra.mxu1 %v78_v8  ;;  %1054 = vmatprep.mubr.msk.f32.mxu0 %vm91_vm0, %v77_v9 }
  0x3e   :  { %1088 = vmatprep.subr.mxu1 %v77_v9  ;;  %1090 = vmatprep.mubr.msk.f32.mxu1 %vm91_vm0, %v1299_v4 }
  0x3f   :  { %1089 = vmatpush3.msra.mxu1 %v77_v9  ;;  %1055 = vmatmul.mubr.msk.f32.gmra.mxu0 %vm91_vm0, %v78_v8 }
  0x40   :  { %1091 = vmatmul.mubr.msk.f32.vlgmr.msra.gmra.mxu1 %vm91_vm0, %v1301_v5  ;;  %1093 = vmatprep.subr.mxu1 %v80_v10 }
  0x41   :  { %1094 = vmatpush3.msra.mxu1 %v80_v10  ;;  %1057 = vmatprep.mubr.msk.f32.mxu0 %vm91_vm0, %v79_v11 }
  0x42   :  { %1095 = vmatprep.subr.mxu1 %v79_v11  ;;  %1097 = vmatprep.mubr.msk.f32.mxu1 %vm91_vm0, %v1299_v4 }
  0x43   :  { %1096 = vmatpush3.msra.mxu1 %v79_v11  ;;  %1058 = vmatmul.mubr.msk.f32.gmra.mxu0 %vm91_vm0, %v80_v10 }
  0x44   :  { %1098 = vmatmul.mubr.msk.f32.vlgmr.msra.gmra.mxu1 %vm91_vm0, %v1301_v5  ;;  %1100 = vmatprep.subr.mxu1 %v82_v12 }
  0x45   :  { %1101 = vmatpush3.msra.mxu1 %v82_v12  ;;  %1060 = vmatprep.mubr.msk.f32.mxu0 %vm91_vm0, %v81_v13 }
  0x46   :  { %1102 = vmatprep.subr.mxu1 %v81_v13  ;;  %1104 = vmatprep.mubr.msk.f32.mxu1 %vm91_vm0, %v1299_v4 }
  0x47   :  { %1103 = vmatpush3.msra.mxu1 %v81_v13  ;;  %1061 = vmatmul.mubr.msk.f32.gmra.mxu0 %vm91_vm0, %v82_v12 }
  0x48   :  { %1105 = vmatmul.mubr.msk.f32.vlgmr.msra.gmra.mxu1 %vm91_vm0, %v1301_v5  ;;  %1107 = vmatprep.subr.mxu1 %v84_v14 }
  0x49   :  { %1108 = vmatpush3.msra.mxu1 %v84_v14  ;;  %1063 = vmatprep.mubr.msk.f32.mxu0 %vm91_vm0, %v83_v15 }
  0x4a   :  { %1109 = vmatprep.subr.mxu1 %v83_v15  ;;  %1111 = vmatprep.mubr.msk.f32.mxu1 %vm91_vm0, %v1299_v4 }
  0x4b   :  { %1110 = vmatpush3.msra.mxu1 %v83_v15  ;;  %1064 = vmatmul.mubr.msk.f32.gmra.mxu0 %vm91_vm0, %v84_v14 }
  0x4c   :  { %1112 = vmatmul.mubr.msk.f32.vlgmr.msra.gmra.mxu1 %vm91_vm0, %v1301_v5  ;;  %1114 = vmatprep.subr.mxu1 %v86_v16 }
  0x4d   :  { %1115 = vmatpush3.msra.mxu1 %v86_v16  ;;  %1066 = vmatprep.mubr.msk.f32.mxu0 %vm91_vm0, %v85_v17 }
  0x4e   :  { %1116 = vmatprep.subr.mxu1 %v85_v17  ;;  %1118 = vmatprep.mubr.msk.f32.mxu1 %vm91_vm0, %v1299_v4 }
  0x4f   :  { %1117 = vmatpush3.msra.mxu1 %v85_v17  ;;  %1067 = vmatmul.mubr.msk.f32.gmra.mxu0 %vm91_vm0, %v86_v16 }
  0x50   :  { %1119 = vmatmul.mubr.msk.f32.vlgmr.msra.gmra.mxu1 %vm91_vm0, %v1301_v5  ;;  %1121 = vmatprep.subr.mxu1 %v88_v18 }
  0x51   :  { %1122 = vmatpush3.msra.mxu1 %v88_v18  ;;  %1069 = vmatprep.mubr.msk.f32.mxu0 %vm91_vm0, %v87_v19 }
  0x52   :  { %1123 = vmatprep.subr.mxu1 %v87_v19  ;;  %1125 = vmatprep.mubr.msk.f32.mxu1 %vm91_vm0, %v1299_v4 }
  0x53   :  { %1124 = vmatpush3.msra.mxu1 %v87_v19  ;;  %1070 = vmatmul.mubr.msk.f32.gmra.mxu0 %vm91_vm0, %v88_v18 }
  0x54   :  { %1126 = vmatmul.mubr.msk.f32.vlgmr.msra.gmra.mxu1 %vm91_vm0, %v1301_v5 }
  0xf7   :  { %v1050_v20 = vpop.f32.mrf.mxu0 }
  0xf8   :  { %v1078_v21 = vpop.f32.mrf.mxu1 }
  0xf9   :  { %v894_v23 = vadd.f32 %v1078_v21, %v1050_v20  ;;  %v206_v24 = vpop.f32.mrf.mxu0 }
  0xfa   :  { %v359_v25 = vpop.f32.mrf.mxu1 }
  0xfb   :  { %v912_v27 = vadd.f32 %v1351_v22, %v894_v23  ;;  %v893_v28 = vadd.f32 %v359_v25, %v206_v24  ;;  %v1053_v29 = vpop.f32.mrf.mxu0 }
  0xfc   :  { %v1085_v31 = vpop.f32.mrf.mxu1 }
  0xfd   :  { %928 = vst.msk [vmem:[#allocation10 + $0x8] sm:$0xff] %vm91_vm0, %v912_v27  ;;  %v911_v30 = vadd.f32 %v1353_v26, %v893_v28  ;;  %v896_v32 = vadd.f32 %v1085_v31, %v1053_v29  ;;  %v216_v33 = vpop.f32.mrf.mxu0 }
  0xfe   :  { %v434_v34 = vpop.f32.mrf.mxu1 }
  0xff   :  { %927 = vst.msk [vmem:[#allocation10] sm:$0xff] %vm91_vm0, %v911_v30  ;;  %v914_v35 = vadd.f32 %v1351_v22, %v896_v32  ;;  %v895_v36 = vadd.f32 %v434_v34, %v216_v33  ;;  %v1056_v37 = vpop.f32.mrf.mxu0 }
 0x100   :  { %v1092_v38 = vpop.f32.mrf.mxu1 }
 0x101   :  { %930 = vst.msk [vmem:[#allocation10 + $0x18] sm:$0xff] %vm91_vm0, %v914_v35  ;;  %v913_v39 = vadd.f32 %v1353_v26, %v895_v36  ;;  %v898_v40 = vadd.f32 %v1092_v38, %v1056_v37  ;;  %v226_v41 = vpop.f32.mrf.mxu0 }
 0x102   :  { %v509_v42 = vpop.f32.mrf.mxu1 }
 0x103   :  { %929 = vst.msk [vmem:[#allocation10 + $0x10] sm:$0xff] %vm91_vm0, %v913_v39  ;;  %v916_v43 = vadd.f32 %v1351_v22, %v898_v40  ;;  %v897_v44 = vadd.f32 %v509_v42, %v226_v41  ;;  %v1059_v45 = vpop.f32.mrf.mxu0 }
 0x104   :  { %v1099_v46 = vpop.f32.mrf.mxu1 }
 0x105   :  { %932 = vst.msk [vmem:[#allocation10 + $0x28] sm:$0xff] %vm91_vm0, %v916_v43  ;;  %v915_v47 = vadd.f32 %v1353_v26, %v897_v44  ;;  %v900_v48 = vadd.f32 %v1099_v46, %v1059_v45  ;;  %v236_v49 = vpop.f32.mrf.mxu0 }
 0x106   :  { %v584_v50 = vpop.f32.mrf.mxu1 }
 0x107   :  { %931 = vst.msk [vmem:[#allocation10 + $0x20] sm:$0xff] %vm91_vm0, %v915_v47  ;;  %v918_v51 = vadd.f32 %v1351_v22, %v900_v48  ;;  %v899_v52 = vadd.f32 %v584_v50, %v236_v49  ;;  %v1062_v53 = vpop.f32.mrf.mxu0 }
 0x108   :  { %v1106_v54 = vpop.f32.mrf.mxu1 }
 0x109   :  { %934 = vst.msk [vmem:[#allocation10 + $0x38] sm:$0xff] %vm91_vm0, %v918_v51  ;;  %v917_v55 = vadd.f32 %v1353_v26, %v899_v52  ;;  %v902_v56 = vadd.f32 %v1106_v54, %v1062_v53  ;;  %v246_v57 = vpop.f32.mrf.mxu0 }
 0x10a   :  { %v659_v58 = vpop.f32.mrf.mxu1 }
 0x10b   :  { %933 = vst.msk [vmem:[#allocation10 + $0x30] sm:$0xff] %vm91_vm0, %v917_v55  ;;  %v920_v59 = vadd.f32 %v1351_v22, %v902_v56  ;;  %v901_v60 = vadd.f32 %v659_v58, %v246_v57  ;;  %v1065_v61 = vpop.f32.mrf.mxu0 }
 0x10c   :  { %v1113_v62 = vpop.f32.mrf.mxu1 }
 0x10d   :  { %936 = vst.msk [vmem:[#allocation10 + $0x48] sm:$0xff] %vm91_vm0, %v920_v59  ;;  %v919_v63 = vadd.f32 %v1353_v26, %v901_v60  ;;  %v904_v0 = vadd.f32 %v1113_v62, %v1065_v61  ;;  %v256_v1 = vpop.f32.mrf.mxu0 }
 0x10e   :  { %v734_v2 = vpop.f32.mrf.mxu1 }
 0x10f   :  { %935 = vst.msk [vmem:[#allocation10 + $0x40] sm:$0xff] %vm91_vm0, %v919_v63  ;;  %v922_v3 = vadd.f32 %v1351_v22, %v904_v0  ;;  %v903_v4 = vadd.f32 %v734_v2, %v256_v1  ;;  %v1068_v5 = vpop.f32.mrf.mxu0 }
 0x110   :  { %v1120_v6 = vpop.f32.mrf.mxu1 }
 0x111   :  { %938 = vst.msk [vmem:[#allocation10 + $0x58] sm:$0xff] %vm91_vm0, %v922_v3  ;;  %v921_v7 = vadd.f32 %v1353_v26, %v903_v4  ;;  %v906_v8 = vadd.f32 %v1120_v6, %v1068_v5  ;;  %v266_v9 = vpop.f32.mrf.mxu0 }
 0x112   :  { %v809_v10 = vpop.f32.mrf.mxu1 }
 0x113   :  { %937 = vst.msk [vmem:[#allocation10 + $0x50] sm:$0xff] %vm91_vm0, %v921_v7  ;;  %v924_v11 = vadd.f32 %v1351_v22, %v906_v8  ;;  %v905_v12 = vadd.f32 %v809_v10, %v266_v9  ;;  %v1071_v13 = vpop.f32.mrf.mxu0 }
 0x114   :  { %v1127_v14 = vpop.f32.mrf.mxu1 }
 0x115   :  { %940 = vst.msk [vmem:[#allocation10 + $0x68] sm:$0xff] %vm91_vm0, %v924_v11  ;;  %v923_v15 = vadd.f32 %v1353_v26, %v905_v12  ;;  %v908_v16 = vadd.f32 %v1127_v14, %v1071_v13  ;;  %v276_v17 = vpop.f32.mrf.mxu0 }
 0x116   :  { %v884_v18 = vpop.f32.mrf.mxu1 }
 0x117   :  { %939 = vst.msk [vmem:[#allocation10 + $0x60] sm:$0xff] %vm91_vm0, %v923_v15  ;;  %v926_v19 = vadd.f32 %v1351_v22, %v908_v16  ;;  %v907_v20 = vadd.f32 %v884_v18, %v276_v17 }
 0x119   :  { %942 = vst.msk [vmem:[#allocation10 + $0x78] sm:$0xff] %vm91_vm0, %v926_v19  ;;  %v925_v21 = vadd.f32 %v1353_v26, %v907_v20 }
 0x11b   :  { %941 = vst.msk [vmem:[#allocation10 + $0x70] sm:$0xff] %vm91_vm0, %v925_v21 }
 0x11c   :  { %1226 = shalt.err (!%p1223_p10)
}
 0x11d   :  { %954 = dma.vmem_to_hbm [thread:$0]  %s949_s3, 2048, %s1397_s4, [#allocation4], %s1245_s20, %s1245_s20, %s1246_s21  }
 0x11e   :  { %1241 = dma.done.wait [#allocation4], 2048  }
 0x11f   :  { %1242 = vsyncadd [#allocation4], 4294965248 }
 0x120   :  { %958 = vsyncpa [#allocation3], 1 }
 0x121   :  { %959 = vsyncpa [#allocation6], 1 }
 0x122   :  { %960 = vsyncpa [#allocation9], 1 }
 0x123   :  { %961 = vsyncpa [#allocation4], 1 }

</bundles_post_ra>
